<compile_context>
chip_gen: v5e
topology: v5e:2x2
jax: 0.10.0
libtpu: 0.0.40
codegen_flags: <defaults>
</compile_context>

<pallas_src>
import functools

import jax
import jax.numpy as jnp
from jax.experimental import pallas as pl
from jax.experimental.pallas import tpu as pltpu

LEAKY_SLOPE = 0.01  # PyTorch nn.LeakyReLU default negative_slope
LANE = 128
SUBLANE = 8


def _round_up(x, m):
    return ((x + m - 1) // m) * m


def _fused_mlp_kernel(num_layers, x_ref, *refs):
    """refs = (w0, b0, w1, b1, ..., w{L-1}, b{L-1}, o_ref). All tiles VMEM-resident."""
    o_ref = refs[-1]
    h = x_ref[...].astype(jnp.float32)              # (BT, in_pad)
    for l in range(num_layers):
        w = refs[2 * l][...]                        # (in_pad_l, out_pad_l)  -- pre-transposed
        b = refs[2 * l + 1][...]                    # (1, out_pad_l)
        y = jnp.dot(h, w, preferred_element_type=jnp.float32) + b
        h = jnp.maximum(y, LEAKY_SLOPE * y)         # LeakyReLU
    o_ref[...] = h.astype(o_ref.dtype)


def mlp_forward(x, params, *, batch_tile=256):
    """Fused MLP forward. x: (batch, n); params: list of (W (out,in), b (out,)) like nn.Linear."""
    batch, in_f = x.shape
    num_layers = len(params)

    # Layer widths and their lane-padded versions.
    dims = [in_f] + [w.shape[0] for (w, _) in params]
    pdims = [_round_up(d, LANE) for d in dims]

    # Batch tiling: pad batch up to a multiple of the tile (tile itself sublane-aligned).
    bt = min(batch_tile, _round_up(batch, SUBLANE))
    pbatch = _round_up(batch, bt)

    # Zero-pad activations.
    x_p = jnp.zeros((pbatch, pdims[0]), x.dtype).at[:batch, :in_f].set(x)

    # Pre-transpose + zero-pad weights to (in_pad, out_pad); biases to (1, out_pad).
    padded_args = []
    for l, (w, b) in enumerate(params):
        out_f, in_f_l = w.shape
        in_p, out_p = pdims[l], pdims[l + 1]
        w_t = jnp.zeros((in_p, out_p), w.dtype).at[:in_f_l, :out_f].set(w.T)
        b_p = jnp.zeros((1, out_p), b.dtype).at[0, :out_f].set(b)
        padded_args += [w_t, b_p]

    grid = (pbatch // bt,)
    in_specs = [pl.BlockSpec((bt, pdims[0]), lambda i: (i, 0))]  # activation stream
    for l in range(num_layers):
        in_p, out_p = pdims[l], pdims[l + 1]
        # Constant index maps -> weights/biases DMA'd once, VMEM-resident across batch tiles.
        in_specs.append(pl.BlockSpec((in_p, out_p), lambda i: (0, 0)))
        in_specs.append(pl.BlockSpec((1, out_p), lambda i: (0, 0)))
    out_specs = pl.BlockSpec((bt, pdims[-1]), lambda i: (i, 0))

    out_padded = pl.pallas_call(
        functools.partial(_fused_mlp_kernel, num_layers),
        out_shape=jax.ShapeDtypeStruct((pbatch, pdims[-1]), x.dtype),
        grid=grid,
        in_specs=in_specs,
        out_specs=out_specs,
        compiler_params=pltpu.CompilerParams(
            dimension_semantics=("parallel",),
        ),
    )(x_p, *padded_args)

    return out_padded[:batch, : dims[-1]]


def init_mlp_params(key, n, hidden_layers):
    """Deterministic init mirroring nn.Linear shapes: W (out, in), b (out,)."""
    dims = [n] + list(hidden_layers) + [n]
    params = []
    for fan_in, fan_out in zip(dims[:-1], dims[1:]):
        kw, kb, key = jax.random.split(key, 3)
        bound = 1.0 / jnp.sqrt(fan_in)
        w = jax.random.uniform(kw, (fan_out, fan_in), jnp.float32, -bound, bound)
        b = jax.random.uniform(kb, (fan_out,), jnp.float32, -bound, bound)
        params.append((w, b))
    return params


def mlp_reference(x, params):
    for w, b in params:
        y = x @ w.T + b
        x = jnp.where(y > 0, y, LEAKY_SLOPE * y)
    return x


if __name__ == "__main__":
    key = jax.random.PRNGKey(0)
    kx, kp = jax.random.split(key)

    n = 32
    hidden = [64, 48]        # MLP(n=32, layers=[64, 48]) -> dims 32 -> 64 -> 48 -> 32
    batch = 8

    x = jax.random.normal(kx, (batch, n), jnp.float32)
    params = init_mlp_params(kp, n, hidden)

    out = mlp_forward(x, params)
    out = jax.block_until_ready(out)

    ref = mlp_reference(x, params)
    assert out.shape == (batch, n)
    assert jnp.allclose(out, ref, atol=1e-5, rtol=1e-5), "mismatch vs reference"

    print("KERNEL_OK")
</pallas_src>

<mosaic_0001>
module attributes {stable_mosaic.version = 11 : i64} {
  func.func @_fused_mlp_kernel(%arg0: i32, %arg1: memref<8x128xf32, #tpu.memory_space<vmem>>, %arg2: memref<128x128xf32, #tpu.memory_space<vmem>>, %arg3: memref<1x128xf32, #tpu.memory_space<vmem>>, %arg4: memref<128x128xf32, #tpu.memory_space<vmem>>, %arg5: memref<1x128xf32, #tpu.memory_space<vmem>>, %arg6: memref<128x128xf32, #tpu.memory_space<vmem>>, %arg7: memref<1x128xf32, #tpu.memory_space<vmem>>, %arg8: memref<8x128xf32, #tpu.memory_space<vmem>>) attributes {dimension_semantics = [#tpu.dimension_semantics<parallel>], iteration_bounds = array<i64: 1>, scalar_prefetch = 0 : i64, scratch_operands = 0 : i64, tpu.core_type = #tpu.core_type<tc>, window_params = [{transform_indices = @transform_0, window_bounds = array<i64: 8, 128>}, {pipeline_mode = #tpu.pipeline_mode<synchronous>, transform_indices = @transform_1, window_bounds = array<i64: 128, 128>}, {pipeline_mode = #tpu.pipeline_mode<synchronous>, transform_indices = @transform_2, window_bounds = array<i64: 1, 128>}, {pipeline_mode = #tpu.pipeline_mode<synchronous>, transform_indices = @transform_3, window_bounds = array<i64: 128, 128>}, {pipeline_mode = #tpu.pipeline_mode<synchronous>, transform_indices = @transform_4, window_bounds = array<i64: 1, 128>}, {pipeline_mode = #tpu.pipeline_mode<synchronous>, transform_indices = @transform_5, window_bounds = array<i64: 128, 128>}, {pipeline_mode = #tpu.pipeline_mode<synchronous>, transform_indices = @transform_6, window_bounds = array<i64: 1, 128>}, {transform_indices = @transform_7, window_bounds = array<i64: 8, 128>}]} {
    %c0 = arith.constant 0 : index
    %c0_0 = arith.constant 0 : index
    %0 = vector.load %arg1[%c0, %c0_0] : memref<8x128xf32, #tpu.memory_space<vmem>>, vector<8x128xf32>
    %c0_1 = arith.constant 0 : index
    %c0_2 = arith.constant 0 : index
    %1 = vector.load %arg2[%c0_1, %c0_2] : memref<128x128xf32, #tpu.memory_space<vmem>>, vector<128x128xf32>
    %c0_3 = arith.constant 0 : index
    %c0_4 = arith.constant 0 : index
    %2 = vector.load %arg3[%c0_3, %c0_4] : memref<1x128xf32, #tpu.memory_space<vmem>>, vector<1x128xf32>
    %cst = arith.constant dense<0.000000e+00> : vector<8x128xf32>
    %3 = tpu.matmul %0, %1, %cst {dimension_numbers = #tpu.dot_dimension_numbers<[1], [0], [0], [1], [0, 0, 1, 1], [], []>} : vector<8x128xf32>, vector<128x128xf32>, vector<8x128xf32> -> vector<8x128xf32>
    %4 = vector.broadcast %2 : vector<1x128xf32> to vector<8x128xf32>
    %5 = arith.addf %3, %4 : vector<8x128xf32>
    %cst_5 = arith.constant 0.00999999977 : f32
    %6 = vector.broadcast %cst_5 : f32 to vector<8x128xf32>
    %7 = arith.mulf %6, %5 : vector<8x128xf32>
    %8 = arith.maximumf %5, %7 : vector<8x128xf32>
    %c0_6 = arith.constant 0 : index
    %c0_7 = arith.constant 0 : index
    %9 = vector.load %arg4[%c0_6, %c0_7] : memref<128x128xf32, #tpu.memory_space<vmem>>, vector<128x128xf32>
    %c0_8 = arith.constant 0 : index
    %c0_9 = arith.constant 0 : index
    %10 = vector.load %arg5[%c0_8, %c0_9] : memref<1x128xf32, #tpu.memory_space<vmem>>, vector<1x128xf32>
    %cst_10 = arith.constant dense<0.000000e+00> : vector<8x128xf32>
    %11 = tpu.matmul %8, %9, %cst_10 {dimension_numbers = #tpu.dot_dimension_numbers<[1], [0], [0], [1], [0, 0, 1, 1], [], []>} : vector<8x128xf32>, vector<128x128xf32>, vector<8x128xf32> -> vector<8x128xf32>
    %12 = vector.broadcast %10 : vector<1x128xf32> to vector<8x128xf32>
    %13 = arith.addf %11, %12 : vector<8x128xf32>
    %cst_11 = arith.constant 0.00999999977 : f32
    %14 = vector.broadcast %cst_11 : f32 to vector<8x128xf32>
    %15 = arith.mulf %14, %13 : vector<8x128xf32>
    %16 = arith.maximumf %13, %15 : vector<8x128xf32>
    %c0_12 = arith.constant 0 : index
    %c0_13 = arith.constant 0 : index
    %17 = vector.load %arg6[%c0_12, %c0_13] : memref<128x128xf32, #tpu.memory_space<vmem>>, vector<128x128xf32>
    %c0_14 = arith.constant 0 : index
    %c0_15 = arith.constant 0 : index
    %18 = vector.load %arg7[%c0_14, %c0_15] : memref<1x128xf32, #tpu.memory_space<vmem>>, vector<1x128xf32>
    %cst_16 = arith.constant dense<0.000000e+00> : vector<8x128xf32>
    %19 = tpu.matmul %16, %17, %cst_16 {dimension_numbers = #tpu.dot_dimension_numbers<[1], [0], [0], [1], [0, 0, 1, 1], [], []>} : vector<8x128xf32>, vector<128x128xf32>, vector<8x128xf32> -> vector<8x128xf32>
    %20 = vector.broadcast %18 : vector<1x128xf32> to vector<8x128xf32>
    %21 = arith.addf %19, %20 : vector<8x128xf32>
    %cst_17 = arith.constant 0.00999999977 : f32
    %22 = vector.broadcast %cst_17 : f32 to vector<8x128xf32>
    %23 = arith.mulf %22, %21 : vector<8x128xf32>
    %24 = arith.maximumf %21, %23 : vector<8x128xf32>
    %c0_18 = arith.constant 0 : index
    %c0_19 = arith.constant 0 : index
    %25 = vector.load %arg8[%c0_18, %c0_19] : memref<8x128xf32, #tpu.memory_space<vmem>>, vector<8x128xf32>
    tpu.vector_store %arg8[%c0_18, %c0_19], %24 {strides = array<i32>} : memref<8x128xf32, #tpu.memory_space<vmem>>, vector<8x128xf32>,
    return
  }
  func.func @transform_0(%arg0: i32) -> (i32, i32) {
    %c0_i32 = arith.constant 0 : i32
    %c0_i32_0 = arith.constant 0 : i32
    return %arg0, %c0_i32 : i32, i32
  }
  func.func @transform_1(%arg0: i32) -> (i32, i32) {
    %c0_i32 = arith.constant 0 : i32
    %c0_i32_0 = arith.constant 0 : i32
    %c0_i32_1 = arith.constant 0 : i32
    return %c0_i32, %c0_i32_0 : i32, i32
  }
  func.func @transform_2(%arg0: i32) -> (i32, i32) {
    %c0_i32 = arith.constant 0 : i32
    %c0_i32_0 = arith.constant 0 : i32
    %c0_i32_1 = arith.constant 0 : i32
    return %c0_i32, %c0_i32_0 : i32, i32
  }
  func.func @transform_3(%arg0: i32) -> (i32, i32) {
    %c0_i32 = arith.constant 0 : i32
    %c0_i32_0 = arith.constant 0 : i32
    %c0_i32_1 = arith.constant 0 : i32
    return %c0_i32, %c0_i32_0 : i32, i32
  }
  func.func @transform_4(%arg0: i32) -> (i32, i32) {
    %c0_i32 = arith.constant 0 : i32
    %c0_i32_0 = arith.constant 0 : i32
    %c0_i32_1 = arith.constant 0 : i32
    return %c0_i32, %c0_i32_0 : i32, i32
  }
  func.func @transform_5(%arg0: i32) -> (i32, i32) {
    %c0_i32 = arith.constant 0 : i32
    %c0_i32_0 = arith.constant 0 : i32
    %c0_i32_1 = arith.constant 0 : i32
    return %c0_i32, %c0_i32_0 : i32, i32
  }
  func.func @transform_6(%arg0: i32) -> (i32, i32) {
    %c0_i32 = arith.constant 0 : i32
    %c0_i32_0 = arith.constant 0 : i32
    %c0_i32_1 = arith.constant 0 : i32
    return %c0_i32, %c0_i32_0 : i32, i32
  }
  func.func @transform_7(%arg0: i32) -> (i32, i32) {
    %c0_i32 = arith.constant 0 : i32
    %c0_i32_0 = arith.constant 0 : i32
    return %arg0, %c0_i32 : i32, i32
  }
}

</mosaic_0001>

<bundles_post_ra>
// kernel: tpu_custom_call.1
= control target key start
LH: loop header
LB: loop body
LE: loop exit
PB: predicated region body
PF: predicated region fallthrough
CT: control target
= control target key end

     0   :  { %12 = vsyncpa [#allocation3], 0  ;;  %s444_s0 = inlined_call_operand.hbm [shape: f32[8,128], index: 0, kind: input, shape index: {}]   ;;  %s445_s1 = inlined_call_operand.hbm [shape: f32[128,128], index: 1, kind: input, shape index: {}]   ;;  %s446_s2 = inlined_call_operand.vmem [shape: f32[1,128], index: 2, kind: input, shape index: {}]   ;;  %s447_s3 = inlined_call_operand.hbm [shape: f32[128,128], index: 3, kind: input, shape index: {}]   ;;  %s448_s4 = inlined_call_operand.vmem [shape: f32[1,128], index: 4, kind: input, shape index: {}]   ;;  %s449_s5 = inlined_call_operand.hbm [shape: f32[128,128], index: 5, kind: input, shape index: {}]   ;;  %s450_s6 = inlined_call_operand.vmem [shape: f32[1,128], index: 6, kind: input, shape index: {}]   ;;  %s451_s7 = inlined_call_operand.hbm [shape: f32[8,128], index: 7, kind: output, shape index: {}]  }
   0x1   :  { %13 = vsyncpa [#allocation6], 0 }
   0x2   :  { %14 = vsyncpa [#allocation9], 0  ;;  %s31_s26 = sshll.u32 %s445_s1, 4  ;;  %s32_s26 = int_to_ptr.hbm [resolvable:$true] %s31_s26 }
   0x3   :  { %15 = vsyncpa [#allocation4], 0  ;;  %s373_s27 = smov [#allocation5]   ;;  %s21_s8 = sshll.u32 %s444_s0, 4  ;;  %s22_s8 = int_to_ptr.hbm [resolvable:$true] %s21_s8 }
   0x4   :  { %s33_s28 = sshll.u32 %s373_s27, 4  ;;  %s374_s9 = smov 128   ;;  %s34_s28 = int_to_ptr.vmem [resolvable:$true] %s33_s28 }
   0x5   :  { %s375_s10 = smov 8   ;;  %s376_s11 = smov [#allocation2]  }
   0x6   :  { %39 = dma.hbm_to_vmem [thread:$0]  %s32_s26, 2048, %s34_s28, [#allocation6], %s374_s9, %s374_s9, %s375_s10  }
   0x7   :  { %s23_s12 = sshll.u32 %s376_s11, 4  ;;  %s46_s15 = sshll.u32 %s447_s3, 4  ;;  %s24_s12 = int_to_ptr.vmem [resolvable:$true] %s23_s12  ;;  %s47_s15 = int_to_ptr.hbm [resolvable:$true] %s46_s15 }
   0x8   :  { %26 = dma.hbm_to_vmem [thread:$0]  %s22_s8, 128, %s24_s12, [#allocation3]  }
   0x9   :  { %s61_s17 = sshll.u32 %s449_s5, 4  ;;  %s377_s18 = smov [#allocation7]   ;;  %s62_s17 = int_to_ptr.hbm [resolvable:$true] %s61_s17 }
   0xa   :  { %s48_s19 = sshll.u32 %s377_s18, 4  ;;  %s378_s0 = smov [#allocation8]   ;;  %s49_s19 = int_to_ptr.vmem [resolvable:$true] %s48_s19 }
   0xb   :  { %54 = dma.hbm_to_vmem [thread:$0]  %s47_s15, 2048, %s49_s19, [#allocation6], %s374_s9, %s374_s9, %s375_s10  }
   0xc   :  { %s63_s20 = sshll.u32 %s378_s0, 4  ;;  %s64_s20 = int_to_ptr.vmem [resolvable:$true] %s63_s20 }
   0xd   :  { %69 = dma.hbm_to_vmem [thread:$0]  %s62_s17, 2048, %s64_s20, [#allocation9], %s374_s9, %s374_s9, %s375_s10  }
   0xe   :  { %365 = dma.done.wait [#allocation3], 128  }
   0xf   :  { %366 = vsyncadd [#allocation3], 4294967168 }
  0x10   :  { %367 = dma.done.wait [#allocation6], 4096  }
  0x11   :  { %368 = vsyncadd [#allocation6], 4294963200 }
  0x12   :  { %369 = dma.done.wait [#allocation9], 2048  }
  0x13   :  { %370 = vsyncadd [#allocation9], 4294965248  ;;  %v104_v0 = vld [vmem:[#allocation5 + $0x78] sm:$0xff]  ;;  %v103_v1 = vld [vmem:[#allocation5 + $0x70] sm:$0xff]  ;;  %s379_s24 = smov [#allocation10]   ;;  %s223_s28 = sshll.u32 %s451_s7, 4  ;;  %s224_s28 = int_to_ptr.hbm [resolvable:$true] %s223_s28 }
  0x14   :  { %109 = vmatpush.msra.mxu0 %v104_v0  ;;  %v102_v2 = vld [vmem:[#allocation5 + $0x68] sm:$0xff]  ;;  %v101_v3 = vld [vmem:[#allocation5 + $0x60] sm:$0xff]  ;;  %v146_v4 = vld [vmem:[#allocation7 + $0x78] sm:$0xff]  ;;  %s221_s25 = sshll.u32 %s379_s24, 4  ;;  %s222_s25 = int_to_ptr.vmem [resolvable:$true] %s221_s25 }
  0x15   :  { %v100_v5 = vld [vmem:[#allocation5 + $0x58] sm:$0xff]  ;;  %151 = vmatpush.msra.mxu1 %v146_v4  ;;  %v145_v6 = vld [vmem:[#allocation7 + $0x70] sm:$0xff]  ;;  %v144_v7 = vld [vmem:[#allocation7 + $0x68] sm:$0xff] }
  0x16   :  { %110 = vmatpush.msra.mxu0 %v103_v1  ;;  %v99_v8 = vld [vmem:[#allocation5 + $0x50] sm:$0xff]  ;;  %v143_v9 = vld [vmem:[#allocation7 + $0x60] sm:$0xff]  ;;  %v98_v10 = vld [vmem:[#allocation5 + $0x48] sm:$0xff] }
  0x17   :  { %152 = vmatpush.msra.mxu1 %v145_v6  ;;  %v142_v11 = vld [vmem:[#allocation7 + $0x58] sm:$0xff]  ;;  %v97_v12 = vld [vmem:[#allocation5 + $0x40] sm:$0xff]  ;;  %v141_v13 = vld [vmem:[#allocation7 + $0x50] sm:$0xff] }
  0x18   :  { %111 = vmatpush.msra.mxu0 %v102_v2  ;;  %v96_v14 = vld [vmem:[#allocation5 + $0x38] sm:$0xff]  ;;  %v140_v15 = vld [vmem:[#allocation7 + $0x48] sm:$0xff]  ;;  %v95_v16 = vld [vmem:[#allocation5 + $0x30] sm:$0xff] }
  0x19   :  { %153 = vmatpush.msra.mxu1 %v144_v7  ;;  %v139_v17 = vld [vmem:[#allocation7 + $0x40] sm:$0xff]  ;;  %v94_v18 = vld [vmem:[#allocation5 + $0x28] sm:$0xff]  ;;  %v138_v19 = vld [vmem:[#allocation7 + $0x38] sm:$0xff] }
  0x1a   :  { %112 = vmatpush.msra.mxu0 %v101_v3  ;;  %v93_v20 = vld [vmem:[#allocation5 + $0x20] sm:$0xff]  ;;  %v137_v21 = vld [vmem:[#allocation7 + $0x30] sm:$0xff]  ;;  %v92_v22 = vld [vmem:[#allocation5 + $0x18] sm:$0xff] }
  0x1b   :  { %154 = vmatpush.msra.mxu1 %v143_v9  ;;  %v136_v23 = vld [vmem:[#allocation7 + $0x28] sm:$0xff]  ;;  %v91_v24 = vld [vmem:[#allocation5 + $0x10] sm:$0xff]  ;;  %v135_v25 = vld [vmem:[#allocation7 + $0x20] sm:$0xff] }
  0x1c   :  { %113 = vmatpush.msra.mxu0 %v100_v5  ;;  %v90_v26 = vld [vmem:[#allocation5 + $0x8] sm:$0xff]  ;;  %v89_v27 = vld [vmem:[#allocation5] sm:$0xff]  ;;  %v88_v28 = vld [vmem:[#allocation2] sm:$0xff] }
  0x1d   :  { %155 = vmatpush.msra.mxu1 %v142_v11  ;;  %v134_v29 = vld [vmem:[#allocation7 + $0x18] sm:$0xff]  ;;  %v133_v30 = vld [vmem:[#allocation7 + $0x10] sm:$0xff]  ;;  %v132_v31 = vld [vmem:[#allocation7 + $0x8] sm:$0xff] }
  0x1e   :  { %114 = vmatpush.msra.mxu0 %v99_v8  ;;  %v131_v32 = vld [vmem:[#allocation7] sm:$0xff]  ;;  %v188_v33 = vld [vmem:[#allocation8 + $0x78] sm:$0xff]  ;;  %v187_v34 = vld [vmem:[#allocation8 + $0x70] sm:$0xff] }
  0x1f   :  { %156 = vmatpush.msra.mxu1 %v141_v13  ;;  %193 = vmatpush.msra.mxu2 %v188_v33  ;;  %v186_v35 = vld [vmem:[#allocation8 + $0x68] sm:$0xff]  ;;  %v185_v36 = vld [vmem:[#allocation8 + $0x60] sm:$0xff]  ;;  %v184_v37 = vld [vmem:[#allocation8 + $0x58] sm:$0xff] }
  0x20   :  { %115 = vmatpush.msra.mxu0 %v98_v10  ;;  %v183_v38 = vld [vmem:[#allocation8 + $0x50] sm:$0xff]  ;;  %v182_v39 = vld [vmem:[#allocation8 + $0x48] sm:$0xff]  ;;  %v181_v40 = vld [vmem:[#allocation8 + $0x40] sm:$0xff] }
  0x21   :  { %157 = vmatpush.msra.mxu1 %v140_v15  ;;  %194 = vmatpush.msra.mxu2 %v187_v34  ;;  %v180_v41 = vld [vmem:[#allocation8 + $0x38] sm:$0xff]  ;;  %v179_v42 = vld [vmem:[#allocation8 + $0x30] sm:$0xff]  ;;  %v178_v43 = vld [vmem:[#allocation8 + $0x28] sm:$0xff] }
  0x22   :  { %116 = vmatpush.msra.mxu0 %v97_v12  ;;  %v177_v44 = vld [vmem:[#allocation8 + $0x20] sm:$0xff]  ;;  %v242_v45 = vld [vmem:[%s446_s2] ss:$0 sm:$0xff]  ;;  %v175_v51 = vld [vmem:[#allocation8 + $0x10] sm:$0xff] }
  0x23   :  { %158 = vmatpush.msra.mxu1 %v139_v17  ;;  %195 = vmatpush.msra.mxu2 %v186_v35  ;;  %v176_v50 = vld [vmem:[#allocation8 + $0x18] sm:$0xff]  ;;  %v174_v52 = vld [vmem:[#allocation8 + $0x8] sm:$0xff]  ;;  %v173_v53 = vld [vmem:[#allocation8] sm:$0xff] }
  0x24   :  { %117 = vmatpush.msra.mxu0 %v96_v14  ;;  %v243_v54 = vld [vmem:[%s448_s4] ss:$0 sm:$0xff] }
  0x25   :  { %159 = vmatpush.msra.mxu1 %v138_v19  ;;  %196 = vmatpush.msra.mxu2 %v185_v36  ;;  %v244_v59 = vld [vmem:[%s450_s6] ss:$0 sm:$0xff] }
  0x26   :  { %118 = vmatpush.msra.mxu0 %v95_v16 }
  0x27   :  { %160 = vmatpush.msra.mxu1 %v137_v21  ;;  %197 = vmatpush.msra.mxu2 %v184_v37 }
  0x28   :  { %119 = vmatpush.msra.mxu0 %v94_v18 }
  0x29   :  { %161 = vmatpush.msra.mxu1 %v136_v23  ;;  %198 = vmatpush.msra.mxu2 %v183_v38 }
  0x2a   :  { %120 = vmatpush.msra.mxu0 %v93_v20 }
  0x2b   :  { %162 = vmatpush.msra.mxu1 %v135_v25  ;;  %199 = vmatpush.msra.mxu2 %v182_v39 }
  0x2c   :  { %121 = vmatpush.msra.mxu0 %v92_v22 }
  0x2d   :  { %163 = vmatpush.msra.mxu1 %v134_v29  ;;  %200 = vmatpush.msra.mxu2 %v181_v40 }
  0x2e   :  { %122 = vmatpush.msra.mxu0 %v91_v24 }
  0x2f   :  { %164 = vmatpush.msra.mxu1 %v133_v30  ;;  %201 = vmatpush.msra.mxu2 %v180_v41 }
  0x30   :  { %123 = vmatpush.msra.mxu0 %v90_v26 }
  0x31   :  { %165 = vmatpush.msra.mxu1 %v132_v31  ;;  %202 = vmatpush.msra.mxu2 %v179_v42 }
  0x32   :  { %124 = vmatpush.msra.mxu0 %v89_v27 }
  0x33   :  { %125 = vmatmul.f32.vlgmr.msra.gmra.mxu0 %v88_v28  ;;  %166 = vmatpush.msra.mxu1 %v131_v32 }
  0x34   :  { %203 = vmatpush.msra.mxu2 %v178_v43 }
  0x36   :  { %204 = vmatpush.msra.mxu2 %v177_v44 }
  0x38   :  { %205 = vmatpush.msra.mxu2 %v176_v50 }
  0x3a   :  { %206 = vmatpush.msra.mxu2 %v175_v51 }
  0x3c   :  { %207 = vmatpush.msra.mxu2 %v174_v52 }
  0x3e   :  { %208 = vmatpush.msra.mxu2 %v173_v53 }
  0xb0   :  { %v126_v46 = vpop.f32.mrf.mxu0 }
  0xb1   :  { %v127_v47 = vadd.f32 %v242_v45, %v126_v46 }
  0xb3   :  { %v129_v48 = vmul.f32 0.01, %v127_v47 }
  0xb5   :  { %v130_v49 = vmax.f32 %v127_v47, %v129_v48 }
  0xb7   :  { %167 = vmatmul.f32.vlgmr.msra.gmra.mxu1 %v130_v49 }
 0x134   :  { %v168_v55 = vpop.f32.mrf.mxu1 }
 0x135   :  { %v169_v56 = vadd.f32 %v243_v54, %v168_v55 }
 0x137   :  { %v171_v57 = vmul.f32 0.01, %v169_v56 }
 0x139   :  { %v172_v58 = vmax.f32 %v169_v56, %v171_v57 }
 0x13b   :  { %209 = vmatmul.f32.vlgmr.msra.gmra.mxu2 %v172_v58 }
 0x1be   :  { %v210_v60 = vpop.f32.mrf.mxu2 }
 0x1bf   :  { %v211_v61 = vadd.f32 %v244_v59, %v210_v60 }
 0x1c1   :  { %v213_v62 = vmul.f32 0.01, %v211_v61 }
 0x1c3   :  { %v214_v63 = vmax.f32 %v211_v61, %v213_v62 }
 0x1c5   :  { %215 = vst [vmem:[#allocation10] sm:$0xff] %v214_v63 }
 0x1c6   :  { %226 = dma.vmem_to_hbm [thread:$0]  %s222_s25, 128, %s224_s28, [#allocation4]  }
 0x1c7   :  { %371 = dma.done.wait [#allocation4], 128  }
 0x1c8   :  { %372 = vsyncadd [#allocation4], 4294967168 }
 0x1c9   :  { %231 = vsyncpa [#allocation3], 1 }
 0x1ca   :  { %232 = vsyncpa [#allocation6], 1 }
 0x1cb   :  { %233 = vsyncpa [#allocation9], 1 }
 0x1cc   :  { %234 = vsyncpa [#allocation4], 1 }

</bundles_post_ra>
